<compile_context>
chip_gen: v7x
topology: tpu7x:2x2x1
jax: 0.10.0
libtpu: 0.0.40
codegen_flags: <defaults>
</compile_context>

<pallas_src>
import functools

import jax
import jax.numpy as jnp
from jax import lax
from jax.experimental import pallas as pl
from jax.experimental.pallas import tpu as pltpu

N_EMBED = 384
BLOCK_SIZE = 256  # max sequence length (tril buffer size in the torch module)
LANES = 128


def _head_kernel(x_ref, w_ref, mask_ref, o_ref, *, head_size, head_size_padded, bb):
    """One grid step == `bb` batch elements.

    x_ref:    (bb, T, C)        bf16
    w_ref:    (C, 3*hsp)        bf16  (k|pad, q|pad, v|pad, each hsp wide)
    mask_ref: (T, T)            f32   additive causal mask (0 / -inf)
    o_ref:    (bb, T, hsp)      f32   (last hsp-hs lanes are zero padding)
    """
    hsp = head_size_padded
    T = x_ref.shape[1]
    C = x_ref.shape[2]

    # Fused projection: one big-M (bb*T, C) x (C, 3*hsp) bf16 matmul, f32 acc.
    x2d = x_ref[...].reshape(bb * T, C)                           # (bb*T, C) bf16
    kqv = jnp.dot(x2d, w_ref[...],
                  preferred_element_type=jnp.float32)             # (bb*T, 3*hsp) f32
    kqv = kqv.reshape(bb, T, 3 * hsp)

    # 128-lane-aligned slices (free views).
    k = kqv[:, :, 0:hsp]
    q = kqv[:, :, hsp:2 * hsp]
    v = kqv[:, :, 2 * hsp:3 * hsp]

    # Scale q by 1/sqrt(true head_size) on the small (bb,T,hsp) tensor.
    scale = jnp.float32(head_size) ** jnp.float32(-0.5)
    qb = (q * scale).astype(jnp.bfloat16)
    kb = k.astype(jnp.bfloat16)
    vb = v.astype(jnp.bfloat16)

    # q @ k^T, batched over bb, contracting the padded 128-deep feature dim
    # (zero padding contributes 0).  No explicit transpose of k.
    scores = jnp.einsum("btd,bsd->bts", qb, kb,
                        preferred_element_type=jnp.float32)       # (bb, T, T) f32
    scores = scores + mask_ref[...]                               # broadcast mask

    m = jnp.max(scores, axis=-1, keepdims=True)
    e = jnp.exp(scores - m)
    denom = jnp.sum(e, axis=-1, keepdims=True)

    # softmax(scores) @ v == (e @ v) / denom : normalize the small (T, hsp)
    # result instead of the (T, T) probabilities.  e in bf16 halves its VMEM
    # traffic into the MXU.
    pv = jnp.einsum("bts,bsd->btd", e.astype(jnp.bfloat16), vb,
                    preferred_element_type=jnp.float32)           # (bb, T, hsp) f32

    o_ref[...] = (pv * pl.reciprocal(denom, approx=True)).astype(o_ref.dtype)


def _pick_bb(B, T, target_rows=512):
    """Batch elements per grid step: fill the MXU M dimension.

    No ">=2 grid steps" clamp (it only shrinks M and adds per-step overhead on
    single-TC v5e/v6e).  TODO(synk): when targeting v7x specifically, cap bb so
    the grid stays even across the two TensorCores.
    """
    bb = max(1, min(B, target_rows // max(T, 1)))
    while B % bb != 0:
        bb -= 1
    return bb


def head_forward(x, wk_t, wq_t, wv_t, *, bb=None):
    """x: (B, T, C) float32; w*_t: (C, head_size) float32 (already transposed,
    i.e. y = x @ w_t matches nn.Linear(C, hs, bias=False))."""
    B, T, C = x.shape
    hs = wk_t.shape[1]
    assert C == wk_t.shape[0] == wq_t.shape[0] == wv_t.shape[0]
    assert T <= BLOCK_SIZE
    # T that is not a multiple of 8 stays correct but costs a relayout on the
    # in-kernel (bb,T,C)->(bb*T,C) reshape.

    if bb is None:
        bb = _pick_bb(B, T)
    assert B % bb == 0
    nb = B // bb

    # Fuse and lane-pad the three projection weights: each of k/q/v starts on
    # a 128-lane boundary -> (C, 3*hsp).  bf16 operands for the MXU.
    hsp = ((hs + LANES - 1) // LANES) * LANES
    pad = hsp - hs

    def _pad(w):
        return jnp.pad(w, ((0, 0), (0, pad))) if pad else w

    w_fused = jnp.concatenate([_pad(wk_t), _pad(wq_t), _pad(wv_t)],
                              axis=1).astype(jnp.bfloat16)        # (C, 3*hsp)
    x_bf16 = x.astype(jnp.bfloat16)

    # Causal additive mask built once; constant index_map keeps it resident.
    row = jnp.arange(T)[:, None]
    col = jnp.arange(T)[None, :]
    neg_mask = jnp.where(col <= row, 0.0, -jnp.inf).astype(jnp.float32)

    kernel = functools.partial(_head_kernel, head_size=hs,
                               head_size_padded=hsp, bb=bb)
    out_padded = pl.pallas_call(
        kernel,
        out_shape=jax.ShapeDtypeStruct((B, T, hsp), jnp.float32),
        grid_spec=pltpu.PrefetchScalarGridSpec(
            num_scalar_prefetch=0,
            grid=(nb,),
            in_specs=[
                pl.BlockSpec((bb, T, C), lambda i: (i, 0, 0)),
                pl.BlockSpec((C, 3 * hsp), lambda i: (0, 0)),
                pl.BlockSpec((T, T), lambda i: (0, 0)),
            ],
            out_specs=pl.BlockSpec((bb, T, hsp), lambda i: (i, 0, 0)),
        ),
        compiler_params=pltpu.CompilerParams(
            dimension_semantics=("parallel",)),
    )(x_bf16, w_fused, neg_mask)

    # Drop the zero lane-padding (cheap; output bytes << input bytes).
    return out_padded[..., :hs] if pad else out_padded


def head_reference(x, wk_t, wq_t, wv_t):
    """Pure-JAX f32 reference mirroring the PyTorch forward (eval mode)."""
    B, T, C = x.shape
    hs = wk_t.shape[1]
    k = x @ wk_t
    q = x @ wq_t
    v = x @ wv_t
    wei = jnp.einsum("btd,bsd->bts", q, k) * hs ** -0.5
    row = jnp.arange(T)[:, None]
    col = jnp.arange(T)[None, :]
    wei = jnp.where(col <= row, wei, -jnp.inf)
    wei = jax.nn.softmax(wei, axis=-1)
    return wei @ v


if __name__ == "__main__":
    head_size = 64
    B, T, C = 2, 8, N_EMBED

    key = jax.random.PRNGKey(0)
    kx, kk, kq, kv = jax.random.split(key, 4)

    x = jax.random.normal(kx, (B, T, C), dtype=jnp.float32)
    # nn.Linear(n_embed, head_size, bias=False) weight is (head_size, n_embed);
    # stored pre-transposed as (n_embed, head_size) so y = x @ W.T == x @ w_t.
    scale = 1.0 / jnp.sqrt(C)
    wk_t = jax.random.uniform(kk, (C, head_size), jnp.float32, -scale, scale)
    wq_t = jax.random.uniform(kq, (C, head_size), jnp.float32, -scale, scale)
    wv_t = jax.random.uniform(kv, (C, head_size), jnp.float32, -scale, scale)

    out = head_forward(x, wk_t, wq_t, wv_t)
    out = jax.block_until_ready(out)

    ref = head_reference(x, wk_t, wq_t, wv_t)
    assert out.shape == (B, T, head_size)
    # Tolerance reflects bf16 MXU operands (f32 accumulation) and the EUP
    # approximate reciprocal in the softmax normalisation.
    assert jnp.allclose(out, ref, atol=3e-2, rtol=3e-2), "mismatch vs reference"

    print("KERNEL_OK")
</pallas_src>

<mosaic_0001>
module attributes {stable_mosaic.version = 11 : i64} {
  func.func @_head_kernel(%arg0: i32, %arg1: memref<2x8x384xbf16, #tpu.memory_space<vmem>>, %arg2: memref<384x384xbf16, #tpu.memory_space<vmem>>, %arg3: memref<8x8xf32, #tpu.memory_space<vmem>>, %arg4: memref<2x8x128xf32, #tpu.memory_space<vmem>>) attributes {dimension_semantics = [#tpu.dimension_semantics<parallel>], iteration_bounds = array<i64: 1>, scalar_prefetch = 0 : i64, scratch_operands = 0 : i64, tpu.core_type = #tpu.core_type<tc>, window_params = [{transform_indices = @transform_0, window_bounds = array<i64: 2, 8, 384>}, {pipeline_mode = #tpu.pipeline_mode<synchronous>, transform_indices = @transform_1, window_bounds = array<i64: 384, 384>}, {pipeline_mode = #tpu.pipeline_mode<synchronous>, transform_indices = @transform_2, window_bounds = array<i64: 8, 8>}, {transform_indices = @transform_3, window_bounds = array<i64: 2, 8, 128>}]} {
    %c0 = arith.constant 0 : index
    %c0_0 = arith.constant 0 : index
    %c0_1 = arith.constant 0 : index
    %0 = vector.load %arg1[%c0, %c0_0, %c0_1] : memref<2x8x384xbf16, #tpu.memory_space<vmem>>, vector<2x8x384xbf16>
    %1 = vector.shape_cast %0 : vector<2x8x384xbf16> to vector<16x384xbf16>
    %c0_2 = arith.constant 0 : index
    %c0_3 = arith.constant 0 : index
    %2 = vector.load %arg2[%c0_2, %c0_3] : memref<384x384xbf16, #tpu.memory_space<vmem>>, vector<384x384xbf16>
    %cst = arith.constant dense<0.000000e+00> : vector<16x384xf32>
    %3 = tpu.matmul %1, %2, %cst {dimension_numbers = #tpu.dot_dimension_numbers<[1], [0], [0], [1], [0, 0, 1, 1], [], []>} : vector<16x384xbf16>, vector<384x384xbf16>, vector<16x384xf32> -> vector<16x384xf32>
    %4 = vector.shape_cast %3 : vector<16x384xf32> to vector<2x8x384xf32>
    %5 = vector.extract_strided_slice %4 {offsets = [0, 0, 0], sizes = [2, 8, 128], strides = [1, 1, 1]} : vector<2x8x384xf32> to vector<2x8x128xf32>
    %6 = vector.extract_strided_slice %4 {offsets = [0, 0, 128], sizes = [2, 8, 128], strides = [1, 1, 1]} : vector<2x8x384xf32> to vector<2x8x128xf32>
    %7 = vector.extract_strided_slice %4 {offsets = [0, 0, 256], sizes = [2, 8, 128], strides = [1, 1, 1]} : vector<2x8x384xf32> to vector<2x8x128xf32>
    %cst_4 = arith.constant 6.400000e+01 : f32
    %cst_5 = arith.constant -5.000000e-01 : f32
    %8 = math.powf %cst_4, %cst_5 : f32
    %9 = vector.broadcast %8 : f32 to vector<2x8x128xf32>
    %10 = arith.mulf %6, %9 : vector<2x8x128xf32>
    %11 = arith.truncf %10 : vector<2x8x128xf32> to vector<2x8x128xbf16>
    %12 = arith.truncf %5 : vector<2x8x128xf32> to vector<2x8x128xbf16>
    %13 = arith.truncf %7 : vector<2x8x128xf32> to vector<2x8x128xbf16>
    "tpu.trace_start"() <{level = 10 : i32, message = "btd,bsd->bts"}> : () -> ()
    %cst_6 = arith.constant dense<0.000000e+00> : vector<2x8x8xf32>
    %14 = tpu.matmul %11, %12, %cst_6 {dimension_numbers = #tpu.dot_dimension_numbers<[2], [2], [1], [1], [0, 0, 0, 1, 1, 1], [0], [0]>} : vector<2x8x128xbf16>, vector<2x8x128xbf16>, vector<2x8x8xf32> -> vector<2x8x8xf32>
    "tpu.trace_stop"() : () -> ()
    %c0_7 = arith.constant 0 : index
    %c0_8 = arith.constant 0 : index
    %15 = vector.load %arg3[%c0_7, %c0_8] : memref<8x8xf32, #tpu.memory_space<vmem>>, vector<8x8xf32>
    %16 = vector.shape_cast %15 : vector<8x8xf32> to vector<1x8x8xf32>
    %17 = vector.broadcast %16 : vector<1x8x8xf32> to vector<2x8x8xf32>
    %18 = arith.addf %14, %17 : vector<2x8x8xf32>
    %cst_9 = arith.constant dense<0xFF800000> : vector<2x8xf32>
    %19 = vector.multi_reduction <maximumf>, %18, %cst_9 [2] : vector<2x8x8xf32> to vector<2x8xf32>
    %20 = vector.shape_cast %19 : vector<2x8xf32> to vector<2x8x1xf32>
    %21 = vector.broadcast %20 : vector<2x8x1xf32> to vector<2x8x8xf32>
    %22 = arith.subf %18, %21 : vector<2x8x8xf32>
    %23 = math.exp %22 : vector<2x8x8xf32>
    %cst_10 = arith.constant dense<0.000000e+00> : vector<2x8xf32>
    %24 = vector.multi_reduction <add>, %23, %cst_10 [2] : vector<2x8x8xf32> to vector<2x8xf32>
    %25 = vector.shape_cast %24 : vector<2x8xf32> to vector<2x8x1xf32>
    %26 = arith.truncf %23 : vector<2x8x8xf32> to vector<2x8x8xbf16>
    "tpu.trace_start"() <{level = 10 : i32, message = "bts,bsd->btd"}> : () -> ()
    %cst_11 = arith.constant dense<0.000000e+00> : vector<2x8x128xf32>
    %27 = tpu.matmul %26, %13, %cst_11 {dimension_numbers = #tpu.dot_dimension_numbers<[2], [1], [1], [2], [0, 0, 0, 1, 1, 2], [0], [0]>} : vector<2x8x8xbf16>, vector<2x8x128xbf16>, vector<2x8x128xf32> -> vector<2x8x128xf32>
    "tpu.trace_stop"() : () -> ()
    %28 = tpu.reciprocal %25 {approx = true} : vector<2x8x1xf32> -> vector<2x8x1xf32>
    %29 = vector.broadcast %28 : vector<2x8x1xf32> to vector<2x8x128xf32>
    %30 = arith.mulf %27, %29 : vector<2x8x128xf32>
    %c0_12 = arith.constant 0 : index
    %c0_13 = arith.constant 0 : index
    %c0_14 = arith.constant 0 : index
    %31 = vector.load %arg4[%c0_12, %c0_13, %c0_14] : memref<2x8x128xf32, #tpu.memory_space<vmem>>, vector<2x8x128xf32>
    tpu.vector_store %arg4[%c0_12, %c0_13, %c0_14], %30 {strides = array<i32>} : memref<2x8x128xf32, #tpu.memory_space<vmem>>, vector<2x8x128xf32>,
    return
  }
  func.func @transform_0(%arg0: i32) -> (i32, i32, i32) {
    %c0_i32 = arith.constant 0 : i32
    %c0_i32_0 = arith.constant 0 : i32
    %c0_i32_1 = arith.constant 0 : i32
    return %arg0, %c0_i32, %c0_i32_0 : i32, i32, i32
  }
  func.func @transform_1(%arg0: i32) -> (i32, i32) {
    %c0_i32 = arith.constant 0 : i32
    %c0_i32_0 = arith.constant 0 : i32
    %c0_i32_1 = arith.constant 0 : i32
    return %c0_i32, %c0_i32_0 : i32, i32
  }
  func.func @transform_2(%arg0: i32) -> (i32, i32) {
    %c0_i32 = arith.constant 0 : i32
    %c0_i32_0 = arith.constant 0 : i32
    %c0_i32_1 = arith.constant 0 : i32
    return %c0_i32, %c0_i32_0 : i32, i32
  }
  func.func @transform_3(%arg0: i32) -> (i32, i32, i32) {
    %c0_i32 = arith.constant 0 : i32
    %c0_i32_0 = arith.constant 0 : i32
    %c0_i32_1 = arith.constant 0 : i32
    return %arg0, %c0_i32, %c0_i32_0 : i32, i32, i32
  }
}

</mosaic_0001>

<bundles_post_ra>
// kernel: tpu_custom_call.1
= control target key start
LH: loop header
LB: loop body
LE: loop exit
PB: predicated region body
PF: predicated region fallthrough
CT: control target
= control target key end

     0   :  { %8 = vsyncpa [#allocation3], 0  ;;  %s1441_s0 = inlined_call_operand.hbm [shape: bf16[2,8,384], index: 0, kind: input, shape index: {}]   ;;  %s1442_s1 = inlined_call_operand.hbm [shape: bf16[384,384], index: 1, kind: input, shape index: {}]   ;;  %s1443_s2 = inlined_call_operand.hbm [shape: f32[8,8], index: 2, kind: input, shape index: {}]   ;;  %s1444_s3 = inlined_call_operand.hbm [shape: f32[2,8,128], index: 3, kind: output, shape index: {}]  }
   0x1   :  { %9 = vsyncpa [#allocation6], 0 }
   0x2   :  { %10 = vsyncpa [#allocation4], 0  ;;  %s1327_s12 = smov [#allocation5]   ;;  %s1328_s14 = smov [#allocation2]  }
   0x3   :  { %s28_s13 = sshll.u32 %s1327_s12, 4  ;;  %s16_s15 = sshll.u32 %s1328_s14, 4  ;;  %s29_s13 = int_to_ptr.vmem [resolvable:$true] %s28_s13  ;;  %s1358_s15 = int_to_ptr.vmem [resolvable:$true] %s16_s15 }
   0x4   :  { %s1233_s18 = scalar_lea.hbm %s1442_s1, 9216 }
   0x5   :  { %p1234_p0 = scmp.ne.s32.totalorder %s1442_s1, %s1233_s18  ;;  %p1237_p1 = scmp.lt.u32.totalorder %s1233_s18, %s1442_s1 }
   0x7   :  { %p1239_p2 = pnand %p1237_p1, %p1234_p0 }
   0x9   :  { %1242 = shalt.err (!%p1239_p2)
}
   0xa   :  { %s1243_s23 = scalar_lea.vmem %s29_s13, 9216  ;;  %p1248_p4 = scmp.lt.s32.totalorder %s29_s13, %s29_s13 }
   0xb   :  { %p1244_p3 = scmp.ne.s32.totalorder %s29_s13, %s1243_s23  ;;  %p1249_p5 = scmp.lt.s32.totalorder %s1243_s23, %s1243_s23 }
   0xd   :  { %p1250_p6 = por %p1249_p5, %p1248_p4 }
   0xf   :  { %p1251_p7 = pnand %p1250_p6, %p1244_p3 }
  0x11   :  { %1254 = shalt.err (!%p1251_p7)
}
  0x12   :  { %s1329_s24 = smov 192   ;;  %s1330_s25 = smov 12  }
  0x13   :  { %34 = dma.hbm_to_vmem [thread:$0]  %s1442_s1, 9216, %s29_s13, [#allocation6], %s1329_s24, %s1329_s24, %s1330_s25  }
  0x14   :  { %s1255_s30 = scalar_lea.hbm %s1441_s0, 384 }
  0x15   :  { %p1256_p8 = scmp.ne.s32.totalorder %s1441_s0, %s1255_s30  ;;  %p1259_p9 = scmp.lt.u32.totalorder %s1255_s30, %s1441_s0 }
  0x17   :  { %p1261_p10 = pnand %p1259_p9, %p1256_p8 }
  0x19   :  { %1264 = shalt.err (!%p1261_p10)
}
  0x1a   :  { %s1265_s8 = scalar_lea.vmem %s1358_s15, 384  ;;  %p1270_p12 = scmp.lt.s32.totalorder %s1358_s15, %s1358_s15 }
  0x1b   :  { %p1266_p11 = scmp.ne.s32.totalorder %s1358_s15, %s1265_s8  ;;  %p1271_p13 = scmp.lt.s32.totalorder %s1265_s8, %s1265_s8 }
  0x1d   :  { %p1272_p0 = por %p1271_p13, %p1270_p12 }
  0x1f   :  { %p1273_p1 = pnand %p1272_p0, %p1266_p11 }
  0x21   :  { %1276 = shalt.err (!%p1273_p1)
}
  0x22   :  { %22 = dma.hbm_to_vmem [thread:$0]  %s1441_s0, 384, %s1358_s15, [#allocation3], %s1329_s24, %s1329_s24, %s1330_s25  }
  0x23   :  { %s1331_s10 = smov [#allocation7]   ;;  %s1277_s14 = scalar_lea.hbm %s1443_s2, 128 }
  0x24   :  { %s41_s11 = sshll.u32 %s1331_s10, 4  ;;  %p1278_p2 = scmp.ne.s32.totalorder %s1443_s2, %s1277_s14  ;;  %s42_s11 = int_to_ptr.vmem [resolvable:$true] %s41_s11 }
  0x25   :  { %p1281_p3 = scmp.lt.u32.totalorder %s1277_s14, %s1443_s2 }
  0x27   :  { %p1283_p4 = pnand %p1281_p3, %p1278_p2 }
  0x29   :  { %1286 = shalt.err (!%p1283_p4)
}
  0x2a   :  { %s1287_s20 = scalar_lea.vmem %s42_s11, 128  ;;  %p1292_p6 = scmp.lt.s32.totalorder %s42_s11, %s42_s11 }
  0x2b   :  { %p1288_p5 = scmp.ne.s32.totalorder %s42_s11, %s1287_s20  ;;  %p1293_p7 = scmp.lt.s32.totalorder %s1287_s20, %s1287_s20 }
  0x2d   :  { %p1294_p8 = por %p1293_p7, %p1292_p6 }
  0x2f   :  { %p1295_p9 = pnand %p1294_p8, %p1288_p5 }
  0x31   :  { %1298 = shalt.err (!%p1295_p9)
}
  0x32   :  { %44 = dma.hbm_to_vmem [thread:$0]  %s1443_s2, 128, %s42_s11, [#allocation6]  }
  0x33   :  { %1321 = dma.done.wait [#allocation3], 384  }
  0x34   :  { %1322 = vsyncadd [#allocation3], 4294966912 }
  0x35   :  { %1323 = dma.done.wait [#allocation6], 9344  }
  0x36   :  { %1324 = vsyncadd [#allocation6], 4294957952  ;;  %v1125_v0 = vld [vmem:[#allocation5 + $0x4] ss:$12 sps:$4 sm:$0xff]   ;;  %v1127_v1 = vld [vmem:[#allocation5] ss:$12 sps:$4 sm:$0xff]  }
  0x37   :  { %555 = vmatprep.subr.bf16.mxu0 %v1125_v0  ;;  %v1128_v2 = vld [vmem:[#allocation5 + $0x1c] ss:$12 sps:$4 sm:$0xff]   ;;  %v1130_v3 = vld [vmem:[#allocation5 + $0x18] ss:$12 sps:$4 sm:$0xff]   ;;  %v1131_v4 = vld [vmem:[#allocation5 + $0x34] ss:$12 sps:$4 sm:$0xff]  }
  0x38   :  { %556 = vmatpush1.bf16.msra.mxu0 %v1127_v1  ;;  %v1133_v5 = vld [vmem:[#allocation5 + $0x30] ss:$12 sps:$4 sm:$0xff]   ;;  %v1134_v6 = vld [vmem:[#allocation5 + $0x4c] ss:$12 sps:$4 sm:$0xff]   ;;  %v1136_v7 = vld [vmem:[#allocation5 + $0x48] ss:$12 sps:$4 sm:$0xff]  }
  0x39   :  { %557 = vmatprep.subr.bf16.mxu0 %v1128_v2  ;;  %v1137_v8 = vld [vmem:[#allocation5 + $0x64] ss:$12 sps:$4 sm:$0xff]   ;;  %v1139_v9 = vld [vmem:[#allocation5 + $0x60] ss:$12 sps:$4 sm:$0xff]   ;;  %v1140_v10 = vld [vmem:[#allocation5 + $0x7c] ss:$12 sps:$4 sm:$0xff]  }
  0x3a   :  { %v1142_v11 = vld [vmem:[#allocation5 + $0x78] ss:$12 sps:$4 sm:$0xff]   ;;  %v1143_v12 = vld [vmem:[#allocation5 + $0x94] ss:$12 sps:$4 sm:$0xff]   ;;  %v1145_v14 = vld [vmem:[#allocation5 + $0x90] ss:$12 sps:$4 sm:$0xff]  }
  0x3b   :  { %v1175_v13 = vld [vmem:[#allocation2 + $0x4] ss:$12 sps:$4 sm:$0xff]   ;;  %v1148_v16 = vld [vmem:[#allocation5 + $0xa8] ss:$12 sps:$4 sm:$0xff]   ;;  %v1149_v17 = vld [vmem:[#allocation5 + $0xc4] ss:$12 sps:$4 sm:$0xff]  }
  0x3c   :  { %558 = vmatpush1.bf16.msra.mxu0 %v1130_v3  ;;  %v1146_v15 = vld [vmem:[#allocation5 + $0xac] ss:$12 sps:$4 sm:$0xff]   ;;  %587 = vmatprep.mubr.bf16.mxu0 %v1175_v13  ;;  %v1152_v19 = vld [vmem:[#allocation5 + $0xdc] ss:$12 sps:$4 sm:$0xff]   ;;  %v1155_v21 = vld [vmem:[#allocation5 + $0xf4] ss:$12 sps:$4 sm:$0xff]  }
  0x3d   :  { %559 = vmatprep.subr.bf16.mxu0 %v1131_v4  ;;  %673 = vmatprep.mubr.bf16.mxu1 %v1175_v13  ;;  %v1151_v18 = vld [vmem:[#allocation5 + $0xc0] ss:$12 sps:$4 sm:$0xff]   ;;  %v1154_v20 = vld [vmem:[#allocation5 + $0xd8] ss:$12 sps:$4 sm:$0xff]   ;;  %v1201_v22 = vld [vmem:[#allocation5 + $0xc8] ss:$12 sps:$4 sm:$0xff]  }
  0x3e   :  { %v1202_v23 = vld [vmem:[#allocation5 + $0x8] ss:$12 sps:$4 sm:$0xff]   ;;  %v1157_v24 = vld [vmem:[#allocation5 + $0xf0] ss:$12 sps:$4 sm:$0xff]   ;;  %1027 = vmatprep.subr.bf16.mxu1 %v1201_v22  ;;  %v1203_v25 = vld [vmem:[#allocation5 + $0xe0] ss:$12 sps:$4 sm:$0xff]  }
  0x3f   :  { %1028 = vmatpush3.bf16.msra.mxu1 %v1202_v23  ;;  %v1204_v26 = vld [vmem:[#allocation5 + $0x20] ss:$12 sps:$4 sm:$0xff]   ;;  %v1205_v27 = vld [vmem:[#allocation5 + $0xf8] ss:$12 sps:$4 sm:$0xff]   ;;  %v1160_v29 = vld [vmem:[#allocation5 + $0x108] ss:$12 sps:$4 sm:$0xff]  }
  0x40   :  { %560 = vmatpush1.bf16.msra.mxu0 %v1133_v5  ;;  %1029 = vmatprep.subr.bf16.mxu1 %v1203_v25  ;;  %v1158_v28 = vld [vmem:[#allocation5 + $0x10c] ss:$12 sps:$4 sm:$0xff]   ;;  %v1207_v31 = vld [vmem:[#allocation5 + $0x110] ss:$12 sps:$4 sm:$0xff]   ;;  %v1209_v35 = vld [vmem:[#allocation5 + $0x128] ss:$12 sps:$4 sm:$0xff]  }
  0x41   :  { %561 = vmatprep.subr.bf16.mxu0 %v1134_v6  ;;  %v1206_v30 = vld [vmem:[#allocation5 + $0x38] ss:$12 sps:$4 sm:$0xff]   ;;  %v1163_v33 = vld [vmem:[#allocation5 + $0x120] ss:$12 sps:$4 sm:$0xff]   ;;  %v1208_v34 = vld [vmem:[#allocation5 + $0x50] ss:$12 sps:$4 sm:$0xff]  }
  0x42   :  { %v1161_v32 = vld [vmem:[#allocation5 + $0x124] ss:$12 sps:$4 sm:$0xff]   ;;  %v1164_v36 = vld [vmem:[#allocation5 + $0x13c] ss:$12 sps:$4 sm:$0xff]   ;;  %v1211_v39 = vld [vmem:[#allocation5 + $0x140] ss:$12 sps:$4 sm:$0xff]  }
  0x43   :  { %1030 = vmatpush3.bf16.msra.mxu1 %v1204_v26  ;;  %v1166_v37 = vld [vmem:[#allocation5 + $0x138] ss:$12 sps:$4 sm:$0xff]   ;;  %v1210_v38 = vld [vmem:[#allocation5 + $0x68] ss:$12 sps:$4 sm:$0xff]   ;;  %v1169_v41 = vld [vmem:[#allocation5 + $0x150] ss:$12 sps:$4 sm:$0xff]  }
  0x44   :  { %562 = vmatpush1.bf16.msra.mxu0 %v1136_v7  ;;  %1031 = vmatprep.subr.bf16.mxu1 %v1205_v27  ;;  %v1167_v40 = vld [vmem:[#allocation5 + $0x154] ss:$12 sps:$4 sm:$0xff]   ;;  %v1213_v43 = vld [vmem:[#allocation5 + $0x158] ss:$12 sps:$4 sm:$0xff]   ;;  %v1215_v47 = vld [vmem:[#allocation5 + $0x170] ss:$12 sps:$4 sm:$0xff]  }
  0x45   :  { %563 = vmatprep.subr.bf16.mxu0 %v1137_v8  ;;  %v1212_v42 = vld [vmem:[#allocation5 + $0x80] ss:$12 sps:$4 sm:$0xff]   ;;  %v1214_v45 = vld [vmem:[#allocation5 + $0x98] ss:$12 sps:$4 sm:$0xff]   ;;  %v1172_v46 = vld [vmem:[#allocation5 + $0x168] ss:$12 sps:$4 sm:$0xff]  }
  0x46   :  { %v1170_v44 = vld [vmem:[#allocation5 + $0x16c] ss:$12 sps:$4 sm:$0xff]   ;;  %v1178_v48 = vld [vmem:[#allocation5 + $0x184] ss:$12 sps:$4 sm:$0xff]   ;;  %v1173_v49 = vld [vmem:[#allocation2] ss:$12 sps:$4 sm:$0xff]  }
  0x47   :  { %1032 = vmatpush3.bf16.msra.mxu1 %v1206_v30  ;;  %v1216_v50 = vld [vmem:[#allocation5 + $0xb0] ss:$12 sps:$4 sm:$0xff]   ;;  %v1176_v51 = vld [vmem:[#allocation5 + $0x180] ss:$12 sps:$4 sm:$0xff]   ;;  %v1217_v53 = vld [vmem:[#allocation5 + $0x188] ss:$12 sps:$4 sm:$0xff]  }
  0x48   :  { %564 = vmatpush1.bf16.msra.mxu0 %v1139_v9  ;;  %1033 = vmatprep.subr.bf16.mxu1 %v1207_v31  ;;  %v1181_v52 = vld [vmem:[#allocation5 + $0x19c] ss:$12 sps:$4 sm:$0xff]   ;;  %v1179_v54 = vld [vmem:[#allocation5 + $0x198] ss:$12 sps:$4 sm:$0xff]   ;;  %v1332_v55 = vmov 0   ;;  %v1333_v57 = vmov 0.0  }
  0x49   :  { %565 = vmatprep.subr.bf16.mxu0 %v1140_v10  ;;  %v1184_v56 = vld [vmem:[#allocation5 + $0x1b4] ss:$12 sps:$4 sm:$0xff]   ;;  %vm1334_vm0 = vmmov 0   ;;  %v1182_v59 = vld [vmem:[#allocation5 + $0x1b0] ss:$12 sps:$4 sm:$0xff]   ;;  %vm836_vm1 = vcmask 1043456  }
  0x4a   :  { %v1218_v58 = vld [vmem:[#allocation5 + $0x1a0] ss:$12 sps:$4 sm:$0xff]   ;;  %v1219_v61 = vld [vmem:[#allocation5 + $0x1b8] ss:$12 sps:$4 sm:$0xff]   ;;  %v1185_v62 = vld [vmem:[#allocation5 + $0x1c8] ss:$12 sps:$4 sm:$0xff]  }
  0x4b   :  { %1034 = vmatpush3.bf16.msra.mxu1 %v1208_v34  ;;  %v1187_v60 = vld [vmem:[#allocation5 + $0x1cc] ss:$12 sps:$4 sm:$0xff]   ;;  %v1190_v63 = vld [vmem:[#allocation5 + $0x1e4] ss:$12 sps:$4 sm:$0xff]   ;;  %v1193_v2 = vld [vmem:[#allocation5 + $0x1fc] ss:$12 sps:$4 sm:$0xff]  }
  0x4c   :  { %566 = vmatpush1.bf16.msra.mxu0 %v1142_v11  ;;  %1035 = vmatprep.subr.bf16.mxu1 %v1209_v35  ;;  %v1220_v0 = vld [vmem:[#allocation5 + $0x1d0] ss:$12 sps:$4 sm:$0xff]   ;;  %v1188_v1 = vld [vmem:[#allocation5 + $0x1e0] ss:$12 sps:$4 sm:$0xff]   ;;  %v1221_v3 = vld [vmem:[#allocation5 + $0x1e8] ss:$12 sps:$4 sm:$0xff]  }
  0x4d   :  { %567 = vmatprep.subr.bf16.mxu0 %v1143_v12  ;;  %v1191_v4 = vld [vmem:[#allocation5 + $0x1f8] ss:$12 sps:$4 sm:$0xff]   ;;  %v1196_v5 = vld [vmem:[#allocation5 + $0x214] ss:$12 sps:$4 sm:$0xff]   ;;  %v1194_v7 = vld [vmem:[#allocation5 + $0x210] ss:$12 sps:$4 sm:$0xff]  }
  0x4e   :  { %v1222_v6 = vld [vmem:[#allocation5 + $0x200] ss:$12 sps:$4 sm:$0xff]   ;;  %v1223_v9 = vld [vmem:[#allocation5 + $0x218] ss:$12 sps:$4 sm:$0xff]   ;;  %v1197_v10 = vld [vmem:[#allocation5 + $0x228] ss:$12 sps:$4 sm:$0xff]  }
  0x4f   :  { %1036 = vmatpush3.bf16.msra.mxu1 %v1210_v38  ;;  %v1199_v8 = vld [vmem:[#allocation5 + $0x22c] ss:$12 sps:$4 sm:$0xff]   ;;  %v1200_v11 = vld [vmem:[#allocation2 + $0x8] ss:$12 sps:$4 sm:$0xff]   ;;  %vm812_vm2 = vcmask 64512   ;;  %s1335_s2 = smov [#allocation8]  }
  0x50   :  { %568 = vmatpush1.bf16.msra.mxu0 %v1145_v14  ;;  %1037 = vmatprep.subr.bf16.mxu1 %v1211_v39  ;;  %v1224_v12 = vld [vmem:[#allocation5 + $0x230] ss:$12 sps:$4 sm:$0xff]   ;;  %v731_v39 = vld [vmem:[#allocation7] sm:$0xff]  ;;  %s937_s21 = sshll.u32 %s1335_s2, 4  ;;  %s938_s21 = int_to_ptr.vmem [resolvable:$true] %s937_s21 }
  0x51   :  { %569 = vmatprep.subr.bf16.mxu0 %v1146_v15  ;;  %s1299_s22 = scalar_lea.vmem %s938_s21, 256  ;;  %p1304_p11 = scmp.lt.s32.totalorder %s938_s21, %s938_s21 }
  0x52   :  { %p1300_p10 = scmp.ne.s32.totalorder %s938_s21, %s1299_s22  ;;  %p1305_p12 = scmp.lt.s32.totalorder %s1299_s22, %s1299_s22 }
  0x53   :  { %1038 = vmatpush3.bf16.msra.mxu1 %v1212_v42 }
  0x54   :  { %570 = vmatpush1.bf16.msra.mxu0 %v1148_v16  ;;  %1039 = vmatprep.subr.bf16.mxu1 %v1213_v43  ;;  %p1306_p13 = por %p1305_p12, %p1304_p11 }
  0x55   :  { %571 = vmatprep.subr.bf16.mxu0 %v1149_v17 }
  0x56   :  { %p1307_p0 = pnand %p1306_p13, %p1300_p10 }
  0x57   :  { %1040 = vmatpush3.bf16.msra.mxu1 %v1214_v45 }
  0x58   :  { %572 = vmatpush1.bf16.msra.mxu0 %v1151_v18  ;;  %1041 = vmatprep.subr.bf16.mxu1 %v1215_v47 }
  0x59   :  { %573 = vmatprep.subr.bf16.mxu0 %v1152_v19 }
  0x5b   :  { %1042 = vmatpush3.bf16.msra.mxu1 %v1216_v50 }
  0x5c   :  { %574 = vmatpush1.bf16.msra.mxu0 %v1154_v20  ;;  %1066 = vmatprep.subr.bf16.mxu1 %v1333_v57 }
  0x5d   :  { %575 = vmatprep.subr.bf16.mxu0 %v1155_v21 }
  0x5e   :  { %674 = vmatmul.mubr.bf16.vlgmr.msra.gmra.mrb[0].mxu1 %v1173_v49 }
  0x5f   :  { %1067 = vmatpush3.bf16.msra.mxu1 %v1217_v53  ;;  %1082 = vmatprep.mubr.msk.bf16.mxu1 %vm1334_vm0, %v1333_v57 }
  0x60   :  { %576 = vmatpush1.bf16.msra.mxu0 %v1157_v24  ;;  %1068 = vmatprep.subr.bf16.mxu1 %v1333_v57 }
  0x61   :  { %577 = vmatprep.subr.bf16.mxu0 %v1158_v28 }
  0x63   :  { %1069 = vmatpush3.bf16.msra.mxu1 %v1218_v58 }
  0x64   :  { %578 = vmatpush1.bf16.msra.mxu0 %v1160_v29  ;;  %1070 = vmatprep.subr.bf16.mxu1 %v1333_v57 }
  0x65   :  { %579 = vmatprep.subr.bf16.mxu0 %v1161_v32 }
  0x67   :  { %1071 = vmatpush3.bf16.msra.mxu1 %v1219_v61 }
  0x68   :  { %580 = vmatpush1.bf16.msra.mxu0 %v1163_v33  ;;  %1072 = vmatprep.subr.bf16.mxu1 %v1333_v57 }
  0x69   :  { %581 = vmatprep.subr.bf16.mxu0 %v1164_v36 }
  0x6b   :  { %1073 = vmatpush3.bf16.msra.mxu1 %v1220_v0 }
  0x6c   :  { %582 = vmatpush1.bf16.msra.mxu0 %v1166_v37  ;;  %1074 = vmatprep.subr.bf16.mxu1 %v1333_v57 }
  0x6d   :  { %583 = vmatprep.subr.bf16.mxu0 %v1167_v40 }
  0x6f   :  { %1075 = vmatpush3.bf16.msra.mxu1 %v1221_v3 }
  0x70   :  { %584 = vmatpush1.bf16.msra.mxu0 %v1169_v41  ;;  %1076 = vmatprep.subr.bf16.mxu1 %v1333_v57 }
  0x71   :  { %585 = vmatprep.subr.bf16.mxu0 %v1170_v44 }
  0x73   :  { %1077 = vmatpush3.bf16.msra.mxu1 %v1222_v6 }
  0x74   :  { %586 = vmatpush1.bf16.msra.mxu0 %v1172_v46  ;;  %1078 = vmatprep.subr.bf16.mxu1 %v1333_v57 }
  0x75   :  { %598 = vmatprep.subr.bf16.mxu0 %v1178_v48 }
  0x77   :  { %588 = vmatmul.mubr.bf16.vlgmr.msra.gmra.mrb[0].mxu0 %v1173_v49  ;;  %1079 = vmatpush3.bf16.msra.mxu1 %v1223_v9 }
  0x78   :  { %599 = vmatpush1.bf16.msra.mxu0 %v1176_v51  ;;  %630 = vmatprep.mubr.bf16.mxu0 %v1332_v55 }
  0x79   :  { %600 = vmatprep.subr.bf16.mxu0 %v1181_v52  ;;  %1080 = vmatprep.subr.bf16.mxu1 %v1333_v57 }
  0x7b   :  { %1081 = vmatpush3.bf16.msra.mxu1 %v1224_v12 }
  0x7c   :  { %601 = vmatpush1.bf16.msra.mxu0 %v1179_v54  ;;  %1086 = vmatprep.subr.bf16.mxu1 %v1333_v57 }
  0x7d   :  { %602 = vmatprep.subr.bf16.mxu0 %v1184_v56 }
  0x7e   :  { %1083 = vmatmul.mubr.bf16.vlgmr.msra.gmra.mrb[4].mxu1 %v1200_v11 }
  0x7f   :  { %1088 = vmatprep.mubr.msk.bf16.mxu1 %vm1334_vm0, %v1333_v57 }
  0x80   :  { %603 = vmatpush1.bf16.msra.mxu0 %v1182_v59 }
  0x81   :  { %604 = vmatprep.subr.bf16.mxu0 %v1187_v60 }
  0x84   :  { %605 = vmatpush1.bf16.msra.mxu0 %v1185_v62 }
  0x85   :  { %606 = vmatprep.subr.bf16.mxu0 %v1190_v63 }
  0x88   :  { %607 = vmatpush1.bf16.msra.mxu0 %v1188_v1 }
  0x89   :  { %608 = vmatprep.subr.bf16.mxu0 %v1193_v2 }
  0x8c   :  { %609 = vmatpush1.bf16.msra.mxu0 %v1191_v4 }
  0x8d   :  { %610 = vmatprep.subr.bf16.mxu0 %v1196_v5 }
  0x90   :  { %611 = vmatpush1.bf16.msra.mxu0 %v1194_v7 }
  0x91   :  { %612 = vmatprep.subr.bf16.mxu0 %v1199_v8 }
  0x94   :  { %613 = vmatpush1.bf16.msra.mxu0 %v1197_v10 }
  0x97   :  { %631 = vmatmul.mubr.bf16.vlgmr.msra.gmra.mrb[0].mxu0 %v1200_v11 }
 0x131   :  { %v1043_v13 = vpop.f32.mrb[0].mxu1 }
 0x132   :  { %v1044_v14 = vpop.f32.mrb[1].mxu1 }
 0x133   :  { %v1045_v15 = vadd.f32 %v1044_v14, %v1043_v13  ;;  %v1046_v16 = vpop.f32.mrb[2].mxu1 }
 0x134   :  { %v1047_v17 = vpop.f32.mrb[3].mxu1 }
 0x135   :  { %v1048_v18 = vadd.f32 %v1047_v17, %v1046_v16 }
 0x151   :  { %v716_v24 = vpop.f32.mrb[4].mxu1 }
 0x152   :  { %v717_v26 = vadd.f32 %v1045_v15, %v716_v24  ;;  %v1084_v27 = vpop.f32.mrb[5].mxu1 }
 0x153   :  { %v719_v28 = vpop.f32.mrb[6].mxu1 }
 0x154   :  { %v720_v29 = vadd.f32 %v1048_v18, %v719_v28  ;;  %v1085_v30 = vpop.f32.mrb[7].mxu1  ;;  %v729_v36 = vpack.c.bf16 %v717_v26, %v717_v26 }
 0x156   :  { %v730_v32 = vpack.c.bf16 %v720_v29, %v720_v29  ;;  %v838_v38 = vsel %vm836_vm1, %v729_v36, 0 }
 0x158   :  { %v884_v34 = vsel %vm836_vm1, %v730_v32, 0 }
 0x16a   :  { %v632_v19 = vpop.f32.mrb[0].mxu0 }
 0x16b   :  { %v727_v20 = vpack.c.bf16 %v632_v19, %v632_v19  ;;  %v634_v21 = vpop.f32.mrb[1].mxu0 }
 0x16c   :  { %v636_v22 = vpop.f32.mrb[2].mxu0  ;;  %v723_v25 = vmul.f32 0.125, %v634_v21 }
 0x16d   :  { %v638_v23 = vpop.f32.mrb[3].mxu0  ;;  %1087 = vmatpush3.bf16.xpose.msra.mxu1 %v727_v20  ;;  %v728_v33 = vpack.c.bf16 %v636_v22, %v636_v22 }
 0x16e   :  { %1092 = vmatprep.subr.bf16.mxu1 %v1333_v57  ;;  %v725_v31 = vpack.c.bf16 %v723_v25, %v723_v25  ;;  %v724_v35 = vmul.f32 0.125, %v638_v23 }
 0x170   :  { %v726_v37 = vpack.c.bf16 %v724_v35, %v724_v35 }
 0x174   :  { %1089 = vmatmul.mubr.bf16.vlgmr.msra.gmra.mrb[8].mxu1 %v725_v31 }
 0x175   :  { %1093 = vmatpush3.bf16.xpose.msra.mxu1 %v728_v33  ;;  %1094 = vmatprep.mubr.msk.bf16.mxu1 %vm1334_vm0, %v1333_v57 }
 0x176   :  { %1098 = vmatprep.subr.bf16.mxu1 %v1333_v57 }
 0x17c   :  { %1095 = vmatmul.mubr.bf16.vlgmr.msra.gmra.mrb[12].mxu1 %v726_v37 }
 0x17d   :  { %1099 = vmatpush3.bf16.msra.mxu1 %v838_v38  ;;  %1100 = vmatprep.mubr.msk.bf16.mxu1 %vm1334_vm0, %v1333_v57 }
 0x17e   :  { %1104 = vmatprep.subr.bf16.mxu1 %v1333_v57 }
 0x247   :  { %v766_v40 = vpop.f32.mrb[8].mxu1 }
 0x248   :  { %v767_v41 = vadd.f32 %v766_v40, %v731_v39  ;;  %v1090_v42 = vpop.f32.mrb[9].mxu1 }
 0x249   :  { %v769_v43 = vpop.f32.mrb[10].mxu1 }
 0x24a   :  { %v1091_v44 = vpop.f32.mrb[11].mxu1  ;;  %v813_v45 = vsel %vm812_vm2, %v767_v41, -inf }
 0x24b   :  { %814 = vmax.xlane.f32.xlu0 %v813_v45 }
 0x24f   :  { %v806_v46 = vpop.f32.mrb[12].mxu1 }
 0x250   :  { %v807_v47 = vadd.f32 %v806_v46, %v731_v39  ;;  %v1096_v48 = vpop.f32.mrb[13].mxu1 }
 0x251   :  { %v809_v49 = vpop.f32.mrb[14].mxu1 }
 0x252   :  { %v1097_v50 = vpop.f32.mrb[15].mxu1  ;;  %v816_v51 = vsel %vm812_vm2, %v807_v47, -inf }
 0x253   :  { %817 = vmax.xlane.f32.xlu0 %v816_v51 }
 0x2d8   :  { %v815_v52 = vpop.xlane.xlu0 %814 }
 0x2d9   :  { %v819_v53 = vsub.f32 %v767_v41, %v815_v52 }
 0x2db   :  { %v821_v54 = vmul.f32 1.442695, %v819_v53 }
 0x2dd   :  { %1225 = vpow2.f32 %v821_v54 }
 0x2e0   :  { %v818_v55 = vpop.xlane.xlu0 %817 }
 0x2e1   :  { %v820_v56 = vsub.f32 %v807_v47, %v818_v55 }
 0x2e3   :  { %v823_v58 = vmul.f32 1.442695, %v820_v56 }
 0x2e5   :  { %1227 = vpow2.f32 %v823_v58 }
 0x2e7   :  { %v1226_v59 = vpop.eup %1225 }
 0x2e8   :  { %v825_v60 = vsel %vm812_vm2, %v1226_v59, 0.0  ;;  %v831_v61 = vpack.c.bf16 %v1226_v59, %v1226_v59 }
 0x2e9   :  { %826 = vadd.xlane.f32.xlu1 %v825_v60 }
 0x2ea   :  { %1101 = vmatmul.mubr.msk.bf16.vlgmr.msra.gmra.mrb[16].mxu1 %vm812_vm2, %v831_v61 }
 0x2eb   :  { %1105 = vmatpush3.bf16.msra.mxu1 %v884_v34  ;;  %1106 = vmatprep.mubr.msk.bf16.mxu1 %vm1334_vm0, %v1333_v57 }
 0x2ef   :  { %v1228_v62 = vpop.eup %1227 }
 0x2f0   :  { %v828_v63 = vsel %vm812_vm2, %v1228_v62, 0.0  ;;  %v832_v0 = vpack.c.bf16 %v1228_v62, %v1228_v62 }
 0x2f1   :  { %829 = vadd.xlane.f32.xlu1 %v828_v63 }
 0x2f2   :  { %1107 = vmatmul.mubr.msk.bf16.vlgmr.msra.gmra.mrb[20].mxu1 %vm812_vm2, %v832_v0 }
 0x376   :  { %v827_v1 = vpop.xlane.xlu1 %826 }
 0x377   :  { %1229 = vrcp.f32 %v827_v1 }
 0x37e   :  { %v830_v2 = vpop.xlane.xlu1 %829 }
 0x37f   :  { %1231 = vrcp.f32 %v830_v2 }
 0x381   :  { %v1230_v3 = vpop.eup %1229 }
 0x389   :  { %v1232_v57 = vpop.eup %1231 }
 0x3bd   :  { %v874_v4 = vpop.f32.mrb[16].mxu1 }
 0x3be   :  { %v928_v5 = vmul.f32 %v1230_v3, %v874_v4  ;;  %v1102_v6 = vpop.f32.mrb[17].mxu1 }
 0x3bf   :  { %v877_v7 = vpop.f32.mrb[18].mxu1 }
 0x3c0   :  { %930 = vst [vmem:[#allocation8] sm:$0xff] %v928_v5  ;;  %v1103_v8 = vpop.f32.mrb[19].mxu1 }
 0x3c5   :  { %v920_v9 = vpop.f32.mrb[20].mxu1 }
 0x3c6   :  { %v929_v10 = vmul.f32 %v1232_v57, %v920_v9  ;;  %v1108_v11 = vpop.f32.mrb[21].mxu1 }
 0x3c7   :  { %v923_v12 = vpop.f32.mrb[22].mxu1 }
 0x3c8   :  { %931 = vst [vmem:[#allocation8 + $0x8] sm:$0xff] %v929_v10  ;;  %v1109_v13 = vpop.f32.mrb[23].mxu1 }
 0x3c9   :  { %1310 = shalt.err (!%p1307_p0)
}
 0x3ca   :  { %s1311_s25 = scalar_lea.hbm %s1444_s3, 256 }
 0x3cb   :  { %p1312_p1 = scmp.ne.s32.totalorder %s1444_s3, %s1311_s25  ;;  %p1315_p2 = scmp.lt.u32.totalorder %s1311_s25, %s1444_s3 }
 0x3cd   :  { %p1317_p3 = pnand %p1315_p2, %p1312_p1 }
 0x3cf   :  { %1320 = shalt.err (!%p1317_p3)
}
 0x3d0   :  { %s1336_s30 = smov 128   ;;  %s1337_s4 = smov 8  }
 0x3d1   :  { %943 = dma.vmem_to_hbm [thread:$0]  %s938_s21, 256, %s1444_s3, [#allocation4], %s1336_s30, %s1336_s30, %s1337_s4  }
 0x3d2   :  { %1325 = dma.done.wait [#allocation4], 256  }
 0x3d3   :  { %1326 = vsyncadd [#allocation4], 4294967040 }
 0x3d4   :  { %947 = vsyncpa [#allocation3], 1 }
 0x3d5   :  { %948 = vsyncpa [#allocation6], 1 }
 0x3d6   :  { %949 = vsyncpa [#allocation4], 1 }

</bundles_post_ra>
